<compile_context>
chip_gen: v7x
topology: tpu7x:2x2x1
jax: 0.10.0
libtpu: 0.0.40
codegen_flags: <defaults>
</compile_context>

<pallas_src>
import functools

import jax
import jax.numpy as jnp
from jax import lax
from jax.experimental import pallas as pl
from jax.experimental.pallas import tpu as pltpu


def _round_up(x, m):
    return ((x + m - 1) // m) * m


def _choose_q_tile(L, itemsize):
    """Query-row tile: a multiple of the sublane packing, capped at 256."""
    sub = 8 * max(1, 4 // max(1, itemsize))  # f32 -> 8, bf16 -> 16, int8 -> 32
    return min(_round_up(L, sub), 256)


def _softmax_weights(qn, kn, scale):
    """Row-wise softmax(scale * qn @ kn^T). qn:(T,D), kn:(L,D) native dtype."""
    s = lax.dot_general(qn, kn, (((1,), (1,)), ((), ())),
                        preferred_element_type=jnp.float32)   # (T, L)
    s = s * scale                                             # post-matmul scale
    m = jnp.max(s, axis=-1, keepdims=True)
    p = jnp.exp(s - m)
    # TODO(synk): on v6e/v7x a bf16 exp path (~2x EUP throughput) is available;
    # kept f32 here to preserve parity with the f32 reference.
    return p * pl.reciprocal(jnp.sum(p, axis=-1, keepdims=True), approx=True)


def _attn_dd_kernel(q_ref, k_ref, v_ref, vres_ref, o_ref, *,
                    nheads, qk_dim, headdim, scale):
    """Data-dependent path. grid = (B, num_qt); q-tile innermost so full-L K/V
    blocks (index depends only on b) stay VMEM-resident across q-tiles."""
    for n in range(nheads):                       # static unroll over heads
        d0, d1 = n * qk_dim, (n + 1) * qk_dim
        h0, h1 = n * headdim, (n + 1) * headdim
        w = _softmax_weights(q_ref[0, :, d0:d1], k_ref[0, :, d0:d1], scale)
        vn = v_ref[0, :, h0:h1]                   # (L, H) native dtype
        on = lax.dot_general(w.astype(vn.dtype), vn, (((1,), (0,)), ((), ())),
                             preferred_element_type=jnp.float32)   # (tq, H)
        on = on + vres_ref[0, :, h0:h1].astype(jnp.float32)        # residual
        o_ref[0, :, h0:h1] = on.astype(o_ref.dtype)                # direct store


def _attn_di_kernel(q_ref, k_ref, v_ref, vres_ref, o_ref, w_ref, *,
                    nheads, qk_dim, headdim, scale):
    """Data-independent path. grid = (num_qt, B); batch innermost. Attention
    weights are batch-invariant: compute once per q-tile (b == 0) into a
    persistent VMEM cache and reuse for b > 0."""
    @pl.when(pl.program_id(1) == 0)
    def _():
        for n in range(nheads):
            d0, d1 = n * qk_dim, (n + 1) * qk_dim
            w = _softmax_weights(q_ref[0, :, d0:d1], k_ref[0, :, d0:d1], scale)
            w_ref[n] = w.astype(w_ref.dtype)

    for n in range(nheads):
        h0, h1 = n * headdim, (n + 1) * headdim
        vn = v_ref[0, :, h0:h1]
        on = lax.dot_general(w_ref[n].astype(vn.dtype), vn,
                             (((1,), (0,)), ((), ())),
                             preferred_element_type=jnp.float32)
        on = on + vres_ref[0, :, h0:h1].astype(jnp.float32)
        o_ref[0, :, h0:h1] = on.astype(o_ref.dtype)


def attention_forward(v, q, k, *, nheads, headdim, qk_dim, is_data_dependent):
    """v: (B, L, d_inner); q, k: (B, L, nheads*qk_dim) if data-dependent,
    else (max_seq_len, nheads, qk_dim) parameter matrices (seq_len==max_seq_len)."""
    B, L, d_inner = v.shape
    assert d_inner == nheads * headdim
    d_state = nheads * qk_dim
    scale = 1.0 / float(qk_dim) ** 0.5

    tq = _choose_q_tile(L, jnp.dtype(v.dtype).itemsize)
    num_qt = pl.cdiv(L, tq)

    # Scoped-VMEM budget: double-buffered blocks + weight scratch + headroom,
    # clamped below v7x's 64 MiB physical VMEM.
    itm_q = jnp.dtype(q.dtype).itemsize
    itm_v = jnp.dtype(v.dtype).itemsize
    blk_bytes = (2 * (tq * d_state + L * d_state) * itm_q
                 + 2 * (L * d_inner + 2 * tq * d_inner) * itm_v
                 + nheads * tq * max(L, 128) * itm_v)
    vmem_limit = int(min(max(2 * blk_bytes + (8 << 20), 32 << 20), 56 << 20))

    if is_data_dependent:
        assert q.shape == (B, L, d_state) and k.shape == (B, L, d_state)
        kernel = functools.partial(_attn_dd_kernel, nheads=nheads,
                                   qk_dim=qk_dim, headdim=headdim, scale=scale)
        grid = (B, num_qt)
        in_specs = [
            pl.BlockSpec((1, tq, d_state), lambda b, qi: (b, qi, 0)),  # q tile
            pl.BlockSpec((1, L, d_state), lambda b, qi: (b, 0, 0)),    # K (resident per b)
            pl.BlockSpec((1, L, d_inner), lambda b, qi: (b, 0, 0)),    # V (resident per b)
            pl.BlockSpec((1, tq, d_inner), lambda b, qi: (b, qi, 0)),  # residual tile
        ]
        out_spec = pl.BlockSpec((1, tq, d_inner), lambda b, qi: (b, qi, 0))
        scratch_shapes = []
        dim_sem = ("parallel", "parallel")
    else:
        assert q.shape == (L, nheads, qk_dim) and k.shape == (L, nheads, qk_dim), \
            "data-independent path requires seq_len == max_seq_len"
        # Flattening (n, d) reproduces the 'l (n d)' packing of the
        # data-dependent inputs, so in-kernel head slicing is identical.
        q = q.reshape(1, L, d_state)
        k = k.reshape(1, L, d_state)
        kernel = functools.partial(_attn_di_kernel, nheads=nheads,
                                   qk_dim=qk_dim, headdim=headdim, scale=scale)
        grid = (num_qt, B)
        in_specs = [
            pl.BlockSpec((1, tq, d_state), lambda qi, b: (0, qi, 0)),  # q tile (resident over b)
            pl.BlockSpec((1, L, d_state), lambda qi, b: (0, 0, 0)),    # K (resident)
            pl.BlockSpec((1, L, d_inner), lambda qi, b: (b, 0, 0)),    # V
            pl.BlockSpec((1, tq, d_inner), lambda qi, b: (b, qi, 0)),  # residual tile
        ]
        out_spec = pl.BlockSpec((1, tq, d_inner), lambda qi, b: (b, qi, 0))
        scratch_shapes = [pltpu.VMEM((nheads, tq, L), v.dtype)]  # weight cache
        # b axis must run sequentially so the cache written at b == 0 is valid.
        dim_sem = ("parallel", "arbitrary")

    return pl.pallas_call(
        kernel,
        out_shape=jax.ShapeDtypeStruct((B, L, d_inner), v.dtype),
        grid_spec=pltpu.PrefetchScalarGridSpec(
            num_scalar_prefetch=0,
            grid=grid,
            in_specs=in_specs,
            out_specs=out_spec,
            scratch_shapes=scratch_shapes,
        ),
        compiler_params=pltpu.CompilerParams(
            dimension_semantics=dim_sem,
            vmem_limit_bytes=vmem_limit),
    )(q, k, v, v)


def attention_reference(v, q, k, *, nheads, headdim, qk_dim, is_data_dependent):
    """Pure-JAX reference mirroring the PyTorch forward (per-head attention)."""
    B, L, d_inner = v.shape
    residual = v
    v4 = v.reshape(B, L, nheads, headdim)
    scale = 1.0 / float(qk_dim) ** 0.5
    if is_data_dependent:
        q4 = q.reshape(B, L, nheads, qk_dim)
        k4 = k.reshape(B, L, nheads, qk_dim)
        qk = jnp.einsum('btnd,blnd->bntl', q4, k4)
        w = jax.nn.softmax(scale * qk, axis=-1)
        out = jnp.einsum('bntl,blnh->btnh', w, v4)
    else:
        # q, k: (max_seq_len, nheads, qk_dim) — per-head attention over positions.
        qk = jnp.einsum('tnd,lnd->ntl', q, k)
        w = jax.nn.softmax(scale * qk, axis=-1)
        out = jnp.einsum('ntl,blnh->btnh', w, v4)
    return out.reshape(B, L, d_inner) + residual


if __name__ == "__main__":
    # Small shapes consistent with the module constraints.
    d_model = 32
    expand = 2
    headdim = 16
    qk_dim = 8
    d_inner = expand * d_model          # 64
    nheads = d_inner // headdim         # 4
    B, L = 2, 8
    max_seq_len = L

    key = jax.random.PRNGKey(0)
    kv, kq, kk, kqm, kkm = jax.random.split(key, 5)

    v = jax.random.normal(kv, (B, L, d_inner), dtype=jnp.float32)
    q_in = jax.random.normal(kq, (B, L, nheads * qk_dim), dtype=jnp.float32)
    k_in = jax.random.normal(kk, (B, L, nheads * qk_dim), dtype=jnp.float32)

    # Deterministic xavier_normal_-style init for the data-independent q/k matrices.
    fan_in = nheads * qk_dim
    fan_out = max_seq_len * qk_dim
    std = (2.0 / (fan_in + fan_out)) ** 0.5
    q_matrix = std * jax.random.normal(kqm, (max_seq_len, nheads, qk_dim), dtype=jnp.float32)
    k_matrix = std * jax.random.normal(kkm, (max_seq_len, nheads, qk_dim), dtype=jnp.float32)

    # --- data-dependent path ---
    out_dd = attention_forward(v, q_in, k_in, nheads=nheads, headdim=headdim,
                               qk_dim=qk_dim, is_data_dependent=True)
    jax.block_until_ready(out_dd)
    ref_dd = attention_reference(v, q_in, k_in, nheads=nheads, headdim=headdim,
                                 qk_dim=qk_dim, is_data_dependent=True)
    assert bool(jnp.allclose(out_dd, ref_dd, atol=2e-3, rtol=2e-3)), "data-dependent mismatch"

    # --- data-independent (parameter) path ---
    out_di = attention_forward(v, q_matrix, k_matrix, nheads=nheads, headdim=headdim,
                               qk_dim=qk_dim, is_data_dependent=False)
    jax.block_until_ready(out_di)
    ref_di = attention_reference(v, q_matrix, k_matrix, nheads=nheads, headdim=headdim,
                                 qk_dim=qk_dim, is_data_dependent=False)
    assert bool(jnp.allclose(out_di, ref_di, atol=2e-3, rtol=2e-3)), "data-independent mismatch"

    print("KERNEL_OK")
</pallas_src>

<mosaic_0001>
module attributes {stable_mosaic.version = 11 : i64} {
  func.func @_attn_dd_kernel(%arg0: i32, %arg1: i32, %arg2: memref<1x8x32xf32, #tpu.memory_space<vmem>>, %arg3: memref<1x8x32xf32, #tpu.memory_space<vmem>>, %arg4: memref<1x8x64xf32, #tpu.memory_space<vmem>>, %arg5: memref<1x8x64xf32, #tpu.memory_space<vmem>>, %arg6: memref<1x8x64xf32, #tpu.memory_space<vmem>>) attributes {dimension_semantics = [#tpu.dimension_semantics<parallel>, #tpu.dimension_semantics<parallel>], iteration_bounds = array<i64: 2, 1>, scalar_prefetch = 0 : i64, scratch_operands = 0 : i64, tpu.core_type = #tpu.core_type<tc>, window_params = [{transform_indices = @transform_0, window_bounds = array<i64: 1, 8, 32>}, {transform_indices = @transform_1, window_bounds = array<i64: 1, 8, 32>}, {transform_indices = @transform_2, window_bounds = array<i64: 1, 8, 64>}, {transform_indices = @transform_3, window_bounds = array<i64: 1, 8, 64>}, {transform_indices = @transform_4, window_bounds = array<i64: 1, 8, 64>}]} {
    %c0 = arith.constant 0 : index
    %c0_0 = arith.constant 0 : index
    %c0_1 = arith.constant 0 : index
    %0 = vector.load %arg2[%c0, %c0_0, %c0_1] : memref<1x8x32xf32, #tpu.memory_space<vmem>>, vector<1x8x8xf32>
    %1 = vector.shape_cast %0 : vector<1x8x8xf32> to vector<8x8xf32>
    %c0_2 = arith.constant 0 : index
    %c0_3 = arith.constant 0 : index
    %c0_4 = arith.constant 0 : index
    %2 = vector.load %arg3[%c0_2, %c0_3, %c0_4] : memref<1x8x32xf32, #tpu.memory_space<vmem>>, vector<1x8x8xf32>
    %3 = vector.shape_cast %2 : vector<1x8x8xf32> to vector<8x8xf32>
    %cst = arith.constant dense<0.000000e+00> : vector<8x8xf32>
    %4 = tpu.matmul %1, %3, %cst {dimension_numbers = #tpu.dot_dimension_numbers<[1], [1], [0], [0], [0, 0, 1, 0], [], []>} : vector<8x8xf32>, vector<8x8xf32>, vector<8x8xf32> -> vector<8x8xf32>
    %cst_5 = arith.constant 0.353553385 : f32
    %5 = vector.broadcast %cst_5 : f32 to vector<8x8xf32>
    %6 = arith.mulf %4, %5 : vector<8x8xf32>
    %cst_6 = arith.constant dense<0xFF800000> : vector<8xf32>
    %7 = vector.multi_reduction <maximumf>, %6, %cst_6 [1] : vector<8x8xf32> to vector<8xf32>
    %8 = vector.shape_cast %7 : vector<8xf32> to vector<8x1xf32>
    %9 = vector.broadcast %8 : vector<8x1xf32> to vector<8x8xf32>
    %10 = arith.subf %6, %9 : vector<8x8xf32>
    %11 = math.exp %10 : vector<8x8xf32>
    %cst_7 = arith.constant dense<0.000000e+00> : vector<8xf32>
    %12 = vector.multi_reduction <add>, %11, %cst_7 [1] : vector<8x8xf32> to vector<8xf32>
    %13 = vector.shape_cast %12 : vector<8xf32> to vector<8x1xf32>
    %14 = tpu.reciprocal %13 {approx = true} : vector<8x1xf32> -> vector<8x1xf32>
    %15 = vector.broadcast %14 : vector<8x1xf32> to vector<8x8xf32>
    %16 = arith.mulf %11, %15 : vector<8x8xf32>
    %c0_8 = arith.constant 0 : index
    %c0_9 = arith.constant 0 : index
    %c0_10 = arith.constant 0 : index
    %17 = vector.load %arg4[%c0_8, %c0_9, %c0_10] : memref<1x8x64xf32, #tpu.memory_space<vmem>>, vector<1x8x16xf32>
    %18 = vector.shape_cast %17 : vector<1x8x16xf32> to vector<8x16xf32>
    %cst_11 = arith.constant dense<0.000000e+00> : vector<8x16xf32>
    %19 = tpu.matmul %16, %18, %cst_11 {dimension_numbers = #tpu.dot_dimension_numbers<[1], [0], [0], [1], [0, 0, 1, 1], [], []>} : vector<8x8xf32>, vector<8x16xf32>, vector<8x16xf32> -> vector<8x16xf32>
    %c0_12 = arith.constant 0 : index
    %c0_13 = arith.constant 0 : index
    %c0_14 = arith.constant 0 : index
    %20 = vector.load %arg5[%c0_12, %c0_13, %c0_14] : memref<1x8x64xf32, #tpu.memory_space<vmem>>, vector<1x8x16xf32>
    %21 = vector.shape_cast %20 : vector<1x8x16xf32> to vector<8x16xf32>
    %22 = arith.addf %19, %21 : vector<8x16xf32>
    %c0_15 = arith.constant 0 : index
    %c0_16 = arith.constant 0 : index
    %c0_17 = arith.constant 0 : index
    %23 = vector.load %arg6[%c0_15, %c0_16, %c0_17] : memref<1x8x64xf32, #tpu.memory_space<vmem>>, vector<1x8x16xf32>
    %24 = vector.shape_cast %23 : vector<1x8x16xf32> to vector<8x16xf32>
    %25 = vector.shape_cast %22 : vector<8x16xf32> to vector<1x8x16xf32>
    tpu.vector_store %arg6[%c0_15, %c0_16, %c0_17], %25 {strides = array<i32>} : memref<1x8x64xf32, #tpu.memory_space<vmem>>, vector<1x8x16xf32>,
    %c0_18 = arith.constant 0 : index
    %c0_19 = arith.constant 0 : index
    %c8 = arith.constant 8 : index
    %26 = vector.load %arg2[%c0_18, %c0_19, %c8] : memref<1x8x32xf32, #tpu.memory_space<vmem>>, vector<1x8x8xf32>
    %27 = vector.shape_cast %26 : vector<1x8x8xf32> to vector<8x8xf32>
    %c0_20 = arith.constant 0 : index
    %c0_21 = arith.constant 0 : index
    %c8_22 = arith.constant 8 : index
    %28 = vector.load %arg3[%c0_20, %c0_21, %c8_22] : memref<1x8x32xf32, #tpu.memory_space<vmem>>, vector<1x8x8xf32>
    %29 = vector.shape_cast %28 : vector<1x8x8xf32> to vector<8x8xf32>
    %cst_23 = arith.constant dense<0.000000e+00> : vector<8x8xf32>
    %30 = tpu.matmul %27, %29, %cst_23 {dimension_numbers = #tpu.dot_dimension_numbers<[1], [1], [0], [0], [0, 0, 1, 0], [], []>} : vector<8x8xf32>, vector<8x8xf32>, vector<8x8xf32> -> vector<8x8xf32>
    %cst_24 = arith.constant 0.353553385 : f32
    %31 = vector.broadcast %cst_24 : f32 to vector<8x8xf32>
    %32 = arith.mulf %30, %31 : vector<8x8xf32>
    %cst_25 = arith.constant dense<0xFF800000> : vector<8xf32>
    %33 = vector.multi_reduction <maximumf>, %32, %cst_25 [1] : vector<8x8xf32> to vector<8xf32>
    %34 = vector.shape_cast %33 : vector<8xf32> to vector<8x1xf32>
    %35 = vector.broadcast %34 : vector<8x1xf32> to vector<8x8xf32>
    %36 = arith.subf %32, %35 : vector<8x8xf32>
    %37 = math.exp %36 : vector<8x8xf32>
    %cst_26 = arith.constant dense<0.000000e+00> : vector<8xf32>
    %38 = vector.multi_reduction <add>, %37, %cst_26 [1] : vector<8x8xf32> to vector<8xf32>
    %39 = vector.shape_cast %38 : vector<8xf32> to vector<8x1xf32>
    %40 = tpu.reciprocal %39 {approx = true} : vector<8x1xf32> -> vector<8x1xf32>
    %41 = vector.broadcast %40 : vector<8x1xf32> to vector<8x8xf32>
    %42 = arith.mulf %37, %41 : vector<8x8xf32>
    %c0_27 = arith.constant 0 : index
    %c0_28 = arith.constant 0 : index
    %c16 = arith.constant 16 : index
    %43 = vector.load %arg4[%c0_27, %c0_28, %c16] : memref<1x8x64xf32, #tpu.memory_space<vmem>>, vector<1x8x16xf32>
    %44 = vector.shape_cast %43 : vector<1x8x16xf32> to vector<8x16xf32>
    %cst_29 = arith.constant dense<0.000000e+00> : vector<8x16xf32>
    %45 = tpu.matmul %42, %44, %cst_29 {dimension_numbers = #tpu.dot_dimension_numbers<[1], [0], [0], [1], [0, 0, 1, 1], [], []>} : vector<8x8xf32>, vector<8x16xf32>, vector<8x16xf32> -> vector<8x16xf32>
    %c0_30 = arith.constant 0 : index
    %c0_31 = arith.constant 0 : index
    %c16_32 = arith.constant 16 : index
    %46 = vector.load %arg5[%c0_30, %c0_31, %c16_32] : memref<1x8x64xf32, #tpu.memory_space<vmem>>, vector<1x8x16xf32>
    %47 = vector.shape_cast %46 : vector<1x8x16xf32> to vector<8x16xf32>
    %48 = arith.addf %45, %47 : vector<8x16xf32>
    %c0_33 = arith.constant 0 : index
    %c0_34 = arith.constant 0 : index
    %c16_35 = arith.constant 16 : index
    %49 = vector.load %arg6[%c0_33, %c0_34, %c16_35] : memref<1x8x64xf32, #tpu.memory_space<vmem>>, vector<1x8x16xf32>
    %50 = vector.shape_cast %49 : vector<1x8x16xf32> to vector<8x16xf32>
    %51 = vector.shape_cast %48 : vector<8x16xf32> to vector<1x8x16xf32>
    tpu.vector_store %arg6[%c0_33, %c0_34, %c16_35], %51 {strides = array<i32>} : memref<1x8x64xf32, #tpu.memory_space<vmem>>, vector<1x8x16xf32>,
    %c0_36 = arith.constant 0 : index
    %c0_37 = arith.constant 0 : index
    %c16_38 = arith.constant 16 : index
    %52 = vector.load %arg2[%c0_36, %c0_37, %c16_38] : memref<1x8x32xf32, #tpu.memory_space<vmem>>, vector<1x8x8xf32>
    %53 = vector.shape_cast %52 : vector<1x8x8xf32> to vector<8x8xf32>
    %c0_39 = arith.constant 0 : index
    %c0_40 = arith.constant 0 : index
    %c16_41 = arith.constant 16 : index
    %54 = vector.load %arg3[%c0_39, %c0_40, %c16_41] : memref<1x8x32xf32, #tpu.memory_space<vmem>>, vector<1x8x8xf32>
    %55 = vector.shape_cast %54 : vector<1x8x8xf32> to vector<8x8xf32>
    %cst_42 = arith.constant dense<0.000000e+00> : vector<8x8xf32>
    %56 = tpu.matmul %53, %55, %cst_42 {dimension_numbers = #tpu.dot_dimension_numbers<[1], [1], [0], [0], [0, 0, 1, 0], [], []>} : vector<8x8xf32>, vector<8x8xf32>, vector<8x8xf32> -> vector<8x8xf32>
    %cst_43 = arith.constant 0.353553385 : f32
    %57 = vector.broadcast %cst_43 : f32 to vector<8x8xf32>
    %58 = arith.mulf %56, %57 : vector<8x8xf32>
    %cst_44 = arith.constant dense<0xFF800000> : vector<8xf32>
    %59 = vector.multi_reduction <maximumf>, %58, %cst_44 [1] : vector<8x8xf32> to vector<8xf32>
    %60 = vector.shape_cast %59 : vector<8xf32> to vector<8x1xf32>
    %61 = vector.broadcast %60 : vector<8x1xf32> to vector<8x8xf32>
    %62 = arith.subf %58, %61 : vector<8x8xf32>
    %63 = math.exp %62 : vector<8x8xf32>
    %cst_45 = arith.constant dense<0.000000e+00> : vector<8xf32>
    %64 = vector.multi_reduction <add>, %63, %cst_45 [1] : vector<8x8xf32> to vector<8xf32>
    %65 = vector.shape_cast %64 : vector<8xf32> to vector<8x1xf32>
    %66 = tpu.reciprocal %65 {approx = true} : vector<8x1xf32> -> vector<8x1xf32>
    %67 = vector.broadcast %66 : vector<8x1xf32> to vector<8x8xf32>
    %68 = arith.mulf %63, %67 : vector<8x8xf32>
    %c0_46 = arith.constant 0 : index
    %c0_47 = arith.constant 0 : index
    %c32 = arith.constant 32 : index
    %69 = vector.load %arg4[%c0_46, %c0_47, %c32] : memref<1x8x64xf32, #tpu.memory_space<vmem>>, vector<1x8x16xf32>
    %70 = vector.shape_cast %69 : vector<1x8x16xf32> to vector<8x16xf32>
    %cst_48 = arith.constant dense<0.000000e+00> : vector<8x16xf32>
    %71 = tpu.matmul %68, %70, %cst_48 {dimension_numbers = #tpu.dot_dimension_numbers<[1], [0], [0], [1], [0, 0, 1, 1], [], []>} : vector<8x8xf32>, vector<8x16xf32>, vector<8x16xf32> -> vector<8x16xf32>
    %c0_49 = arith.constant 0 : index
    %c0_50 = arith.constant 0 : index
    %c32_51 = arith.constant 32 : index
    %72 = vector.load %arg5[%c0_49, %c0_50, %c32_51] : memref<1x8x64xf32, #tpu.memory_space<vmem>>, vector<1x8x16xf32>
    %73 = vector.shape_cast %72 : vector<1x8x16xf32> to vector<8x16xf32>
    %74 = arith.addf %71, %73 : vector<8x16xf32>
    %c0_52 = arith.constant 0 : index
    %c0_53 = arith.constant 0 : index
    %c32_54 = arith.constant 32 : index
    %75 = vector.load %arg6[%c0_52, %c0_53, %c32_54] : memref<1x8x64xf32, #tpu.memory_space<vmem>>, vector<1x8x16xf32>
    %76 = vector.shape_cast %75 : vector<1x8x16xf32> to vector<8x16xf32>
    %77 = vector.shape_cast %74 : vector<8x16xf32> to vector<1x8x16xf32>
    tpu.vector_store %arg6[%c0_52, %c0_53, %c32_54], %77 {strides = array<i32>} : memref<1x8x64xf32, #tpu.memory_space<vmem>>, vector<1x8x16xf32>,
    %c0_55 = arith.constant 0 : index
    %c0_56 = arith.constant 0 : index
    %c24 = arith.constant 24 : index
    %78 = vector.load %arg2[%c0_55, %c0_56, %c24] : memref<1x8x32xf32, #tpu.memory_space<vmem>>, vector<1x8x8xf32>
    %79 = vector.shape_cast %78 : vector<1x8x8xf32> to vector<8x8xf32>
    %c0_57 = arith.constant 0 : index
    %c0_58 = arith.constant 0 : index
    %c24_59 = arith.constant 24 : index
    %80 = vector.load %arg3[%c0_57, %c0_58, %c24_59] : memref<1x8x32xf32, #tpu.memory_space<vmem>>, vector<1x8x8xf32>
    %81 = vector.shape_cast %80 : vector<1x8x8xf32> to vector<8x8xf32>
    %cst_60 = arith.constant dense<0.000000e+00> : vector<8x8xf32>
    %82 = tpu.matmul %79, %81, %cst_60 {dimension_numbers = #tpu.dot_dimension_numbers<[1], [1], [0], [0], [0, 0, 1, 0], [], []>} : vector<8x8xf32>, vector<8x8xf32>, vector<8x8xf32> -> vector<8x8xf32>
    %cst_61 = arith.constant 0.353553385 : f32
    %83 = vector.broadcast %cst_61 : f32 to vector<8x8xf32>
    %84 = arith.mulf %82, %83 : vector<8x8xf32>
    %cst_62 = arith.constant dense<0xFF800000> : vector<8xf32>
    %85 = vector.multi_reduction <maximumf>, %84, %cst_62 [1] : vector<8x8xf32> to vector<8xf32>
    %86 = vector.shape_cast %85 : vector<8xf32> to vector<8x1xf32>
    %87 = vector.broadcast %86 : vector<8x1xf32> to vector<8x8xf32>
    %88 = arith.subf %84, %87 : vector<8x8xf32>
    %89 = math.exp %88 : vector<8x8xf32>
    %cst_63 = arith.constant dense<0.000000e+00> : vector<8xf32>
    %90 = vector.multi_reduction <add>, %89, %cst_63 [1] : vector<8x8xf32> to vector<8xf32>
    %91 = vector.shape_cast %90 : vector<8xf32> to vector<8x1xf32>
    %92 = tpu.reciprocal %91 {approx = true} : vector<8x1xf32> -> vector<8x1xf32>
    %93 = vector.broadcast %92 : vector<8x1xf32> to vector<8x8xf32>
    %94 = arith.mulf %89, %93 : vector<8x8xf32>
    %c0_64 = arith.constant 0 : index
    %c0_65 = arith.constant 0 : index
    %c48 = arith.constant 48 : index
    %95 = vector.load %arg4[%c0_64, %c0_65, %c48] : memref<1x8x64xf32, #tpu.memory_space<vmem>>, vector<1x8x16xf32>
    %96 = vector.shape_cast %95 : vector<1x8x16xf32> to vector<8x16xf32>
    %cst_66 = arith.constant dense<0.000000e+00> : vector<8x16xf32>
    %97 = tpu.matmul %94, %96, %cst_66 {dimension_numbers = #tpu.dot_dimension_numbers<[1], [0], [0], [1], [0, 0, 1, 1], [], []>} : vector<8x8xf32>, vector<8x16xf32>, vector<8x16xf32> -> vector<8x16xf32>
    %c0_67 = arith.constant 0 : index
    %c0_68 = arith.constant 0 : index
    %c48_69 = arith.constant 48 : index
    %98 = vector.load %arg5[%c0_67, %c0_68, %c48_69] : memref<1x8x64xf32, #tpu.memory_space<vmem>>, vector<1x8x16xf32>
    %99 = vector.shape_cast %98 : vector<1x8x16xf32> to vector<8x16xf32>
    %100 = arith.addf %97, %99 : vector<8x16xf32>
    %c0_70 = arith.constant 0 : index
    %c0_71 = arith.constant 0 : index
    %c48_72 = arith.constant 48 : index
    %101 = vector.load %arg6[%c0_70, %c0_71, %c48_72] : memref<1x8x64xf32, #tpu.memory_space<vmem>>, vector<1x8x16xf32>
    %102 = vector.shape_cast %101 : vector<1x8x16xf32> to vector<8x16xf32>
    %103 = vector.shape_cast %100 : vector<8x16xf32> to vector<1x8x16xf32>
    tpu.vector_store %arg6[%c0_70, %c0_71, %c48_72], %103 {strides = array<i32>} : memref<1x8x64xf32, #tpu.memory_space<vmem>>, vector<1x8x16xf32>,
    return
  }
  func.func @transform_0(%arg0: i32, %arg1: i32) -> (i32, i32, i32) {
    %c0_i32 = arith.constant 0 : i32
    %c0_i32_0 = arith.constant 0 : i32
    return %arg0, %arg1, %c0_i32 : i32, i32, i32
  }
  func.func @transform_1(%arg0: i32, %arg1: i32) -> (i32, i32, i32) {
    %c0_i32 = arith.constant 0 : i32
    %c0_i32_0 = arith.constant 0 : i32
    %c0_i32_1 = arith.constant 0 : i32
    return %arg0, %c0_i32, %c0_i32_0 : i32, i32, i32
  }
  func.func @transform_2(%arg0: i32, %arg1: i32) -> (i32, i32, i32) {
    %c0_i32 = arith.constant 0 : i32
    %c0_i32_0 = arith.constant 0 : i32
    %c0_i32_1 = arith.constant 0 : i32
    return %arg0, %c0_i32, %c0_i32_0 : i32, i32, i32
  }
  func.func @transform_3(%arg0: i32, %arg1: i32) -> (i32, i32, i32) {
    %c0_i32 = arith.constant 0 : i32
    %c0_i32_0 = arith.constant 0 : i32
    return %arg0, %arg1, %c0_i32 : i32, i32, i32
  }
  func.func @transform_4(%arg0: i32, %arg1: i32) -> (i32, i32, i32) {
    %c0_i32 = arith.constant 0 : i32
    %c0_i32_0 = arith.constant 0 : i32
    return %arg0, %arg1, %c0_i32 : i32, i32, i32
  }
}

</mosaic_0001>

<bundles_post_ra>
// kernel: tpu_custom_call.1
= control target key start
LH: loop header
LB: loop body
LE: loop exit
PB: predicated region body
PF: predicated region fallthrough
CT: control target
= control target key end

     0   :  { %s2025_s0 = inlined_call_operand.hbm [shape: f32[2,8,32], index: 0, kind: input, shape index: {}]   ;;  %s2026_s1 = inlined_call_operand.hbm [shape: f32[2,8,32], index: 1, kind: input, shape index: {}]   ;;  %s2027_s2 = inlined_call_operand.hbm [shape: f32[2,8,64], index: 2, kind: input, shape index: {}]   ;;  %s2028_s3 = inlined_call_operand.hbm [shape: f32[2,8,64], index: 3, kind: input, shape index: {}]   ;;  %s2029_s4 = inlined_call_operand.hbm [shape: f32[2,8,64], index: 4, kind: output, shape index: {}]  }
   0x1   :  { %2039 = sst [smem:[#allocation20_spill]] %s2026_s1 }
   0x2   :  { %9 = vsyncpa [#allocation3], 0 }
   0x3   :  { %11 = vsyncpa [#allocation3 + $0x1], 0 }
   0x4   :  { %12 = vsyncpa [#allocation6], 0 }
   0x5   :  { %14 = vsyncpa [#allocation6 + $0x1], 0 }
   0x6   :  { %15 = vsyncpa [#allocation9], 0 }
   0x7   :  { %17 = vsyncpa [#allocation9 + $0x1], 0 }
   0x8   :  { %18 = vsyncpa [#allocation4], 0 }
   0x9   :  { %20 = vsyncpa [#allocation4 + $0x1], 0  ;;  %s1665_s15 = smov 0   ;;  %s1667_s16 = smov 0  }
   0xa   :  { %s1669_s17 = smov 0   ;;  %s1671_s18 = smov 0  }
   0xb   :  { %s1673_s19 = smov 0   ;;  %s1675_s20 = smov 0  }
   0xc LB: > { %2040 = sst [smem:[#allocation15_spill]] %s1611_s17  ;;  %s1696_s21 = sadd.s32 4294967295, %s1623_s20   ;;  %s1623_s20 = sphi %s1675_s20, %s26_s20   ;;  %s1619_s19 = sphi %s1673_s19, %s2066_s19   ;;  %s1615_s18 = sphi %s1671_s18, %s2065_s18   ;;  %s1611_s17 = sphi %s1669_s17, %s2064_s17   ;;  %s1607_s16 = sphi %s1667_s16, %s2068_s16   ;;  %s1603_s15 = sphi %s1665_s15, %s2067_s15  }
   0xd   : > { %2041 = sst [smem:[#allocation16_spill]] %s1619_s19  ;;  %s1221_s22 = sadd.s32 4294967294, %s1623_s20  }
   0xe   : > { %2042 = sst [smem:[#allocation17_spill]] %s1623_s20  ;;  %s38_s23 = sadd.s32 1, %s1619_s19 }
   0xf   : > { %s47_s24 = sadd.s32 1, %s1611_s17  ;;  %p40_p0 = scmp.ge.s32.totalorder %s38_s23, 2 }
  0x10   : > { %p54_p1 = scmp.ne.s32.totalorder %s1611_s17, %s1607_s16  ;;  %p55_p2 = scmp.eq.s32.totalorder %s1623_s20, 0 }
  0x11   : > { %p60_p3 = scmp.ne.s32.totalorder %s1607_s16, %s1603_s15  ;;  %s2070_s23 = smov (%p40_p0, %s38_s23), 0 }
  0x12   : > { %2043 = sst [smem:[#allocation18_spill]] %s2070_s23  ;;  %p1708_p4 = por %p55_p2, %p54_p1 }
  0x13   : > { %p61_p5 = scmp.eq.s32.totalorder %s1696_s21, 0  ;;  %s42_s26 = ssub.s32 %s1619_s19, %s2070_s23 }
  0x14   : > { %p166_p6 = scmp.eq.s32.totalorder %s1696_s21, 1  ;;  %p45_p7 = scmp.eq.s32.totalorder %s42_s26, 0 }
  0x15   : > { %p1716_p8 = por %p61_p5, %p60_p3  ;;  %p172_p10 = scmp.eq.s32.totalorder %s1221_s22, 1 }
  0x16   : > { %p1720_p9 = por %p166_p6, %p54_p1  ;;  %p1337_p13 = scmp.lt.s32.totalorder %s1623_s20, 2 }
  0x17   : > { %s2045_s27 = scalar_select %p1716_p8, 1, 0 }
  0x18   : > { %s2046_s28 = scalar_select %p1720_p9, 1, 0 }
  0x19   : > { %s1725_s29 = scalar_select %p45_p7, %s1611_s17, %s47_s24  }
  0x1a   : > { %p1727_p11 = por %p172_p10, %p60_p3  ;;  %s1734_s5 = sand.u32 1, %s1611_s17  }
  0x1b   : > { %2047 = sst [smem:[#allocation19_spill]] %s1725_s29  ;;  %s1737_s6 = sshll.u32 %s1734_s5, 3 }
  0x1c   : > { %s2048_s30 = scalar_select %p1727_p11, 1, 0 }
  0x1d   : > { %s1740_s7 = sshll.u32 %s1619_s19, 7  ;;  %p1744_p0 = pnand %p1337_p13, %p1708_p4 }
  0x1e   : > { %s211_s9 = sand.u32 1, %s1623_s20   ;;  %s2050_s1 = sld [smem:[#allocation20_spill]] }
  0x1f   : > { %s2049_s8 = scalar_select %p1744_p0, 1, 0 }
  0x20   : > { %s215_s13 = scalar_lea.vmem [#allocation5], %s1737_s6  ;;  %s1760_s22 = scalar_lea.sflag [#allocation6], %s211_s9 }
  0x21   : > { %s222_s14 = sshll.u32 %s215_s13, 4  ;;  %p1766_p4 = pneg %p1744_p0  ;;  %s1757_s14 = int_to_ptr.vmem [resolvable:$true] %s222_s14 }
  0x24   : > { %s1753_s12 = scalar_lea.hbm %s2050_s1, %s1740_s7  ;;  %s1418_s11 = scalar_lea.hbm %s2050_s1, 256 }
  0x25   : > { %s1413_s24 = scalar_lea.hbm %s1753_s12, 128  ;;  %p1419_p7 = scmp.lt.u32.totalorder %s1753_s12, %s2050_s1 }
  0x26   : > { %p1414_p3 = scmp.ne.s32.totalorder %s1753_s12, %s1413_s24  ;;  %p1420_p10 = scmp.lt.u32.totalorder %s1418_s11, %s1413_s24 }
  0x27   : > { %p1422_p12 = scmp.lt.u32.totalorder %s1413_s24, %s1753_s12 }
  0x28   : > { %p1416_p5 = pnand %p1766_p4, %p1414_p3  ;;  %p1421_p13 = por %p1420_p10, %p1419_p7 }
  0x2a   : > { %p1417_p6 = pneg %p1416_p5  ;;  %p1423_p1 = por %p1422_p12, %p1421_p13 }
  0x2c   : > { %p1424_p2 = pnand %p1423_p1, %p1417_p6 }
  0x2e   : > { %1427 = shalt.err (!%p1424_p2)
}
  0x2f   : > { %s1428_s9 = scalar_lea.vmem %s1757_s14, 128  ;;  %s1625_s26 = smov [#allocation5]  }
  0x30   : > { %p1429_p3 = scmp.ne.s32.totalorder %s1757_s14, %s1428_s9  ;;  %s1433_s10 = sshll.u32 %s1625_s26, 4  ;;  %s1434_s10 = int_to_ptr.vmem [resolvable:$false] %s1433_s10 }
  0x31   : > { %s1435_s23 = scalar_lea.vmem %s1434_s10, 256  ;;  %p1436_p9 = scmp.lt.s32.totalorder %s1757_s14, %s1434_s10 }
  0x32   : > { %p1431_p5 = pnand %p1429_p3, %p1766_p4  ;;  %p1437_p8 = scmp.lt.s32.totalorder %s1435_s23, %s1428_s9 }
  0x34   : > { %p1432_p11 = pneg %p1431_p5  ;;  %p1438_p7 = por %p1437_p8, %p1436_p9 }
  0x36   : > { %p1439_p10 = pnand %p1438_p7, %p1432_p11 }
  0x38   : > { %1442 = shalt.err (!%p1439_p10)
}
  0x39   : > { %1326 = dma.hbm_to_vmem [thread:$0]  (!%p1744_p0), %s1753_s12, 128, %s1757_s14, %s1760_s22  }
  0x3a   : > { %p2052_p12 = scmp.lt.s32.totalorder %s1623_s20, 3  ;;  %p2053_p1 = scmp.ge.s32.totalorder %s1623_s20, 1 }
  0x3b   : > { %s1802_s9 = scalar_lea.hbm %s2025_s0, %s1740_s7  ;;  %s196_s26 = scalar_lea.vmem [#allocation2], %s1737_s6 }
  0x3c   : > { %p1794_p2 = pnand %p2053_p1, %p2052_p12  ;;  %s204_s10 = sshll.u32 %s196_s26, 4  ;;  %s1805_s10 = int_to_ptr.vmem [resolvable:$true] %s204_s10 }
  0x3d   : > { %s1811_s23 = scalar_lea.hbm %s2027_s2, %s1740_s7  ;;  %s193_s1 = scalar_lea.sflag [#allocation3], %s1734_s5 }
  0x3e   : > { %s2054_s24 = scalar_select %p1794_p2, 1, 0 }
  0x3f   : > { %s1443_s19 = scalar_lea.hbm %s1802_s9, 128  ;;  %s1448_s29 = scalar_lea.hbm %s2025_s0, 256 }
  0x40   : > { %p1444_p8 = scmp.ne.s32.totalorder %s1802_s9, %s1443_s19  ;;  %p1449_p6 = scmp.lt.u32.totalorder %s1802_s9, %s2025_s0 }
  0x41   : > { %p1450_p13 = scmp.lt.u32.totalorder %s1448_s29, %s1443_s19  ;;  %p1452_p5 = scmp.lt.u32.totalorder %s1443_s19, %s1802_s9 }
  0x42   : > { %p1446_p9 = pnand %p1444_p8, %p1766_p4 }
  0x43   : > { %p1451_p3 = por %p1450_p13, %p1449_p6 }
  0x44   : > { %p1447_p11 = pneg %p1446_p9 }
  0x45   : > { %p1453_p7 = por %p1452_p5, %p1451_p3 }
  0x47   : > { %p1454_p10 = pnand %p1453_p7, %p1447_p11 }
  0x49   : > { %1457 = shalt.err (!%p1454_p10)
}
  0x4a   : > { %s1458_s26 = scalar_lea.vmem %s1805_s10, 128  ;;  %s1626_s12 = smov [#allocation2]  }
  0x4b   : > { %p1459_p12 = scmp.ne.s32.totalorder %s1805_s10, %s1458_s26  ;;  %s1463_s14 = sshll.u32 %s1626_s12, 4  ;;  %s1464_s14 = int_to_ptr.vmem [resolvable:$false] %s1463_s14 }
  0x4c   : > { %s1465_s17 = scalar_lea.vmem %s1464_s14, 256  ;;  %p1466_p9 = scmp.lt.s32.totalorder %s1805_s10, %s1464_s14 }
  0x4d   : > { %p1461_p1 = pnand %p1459_p12, %p1766_p4  ;;  %p1467_p2 = scmp.lt.s32.totalorder %s1465_s17, %s1458_s26 }
  0x4f   : > { %p1462_p8 = pneg %p1461_p1  ;;  %p1468_p6 = por %p1467_p2, %p1466_p9 }
  0x51   : > { %p1469_p13 = pnand %p1468_p6, %p1462_p8 }
  0x53   : > { %1472 = shalt.err (!%p1469_p13)
}
  0x54   : > { %1323 = dma.hbm_to_vmem [thread:$0]  (!%p1744_p0), %s1802_s9, 128, %s1805_s10, %s193_s1  }
  0x55   : > { %s233_s19 = scalar_lea.vmem [#allocation7], %s1737_s6  ;;  %s1473_s29 = scalar_lea.hbm %s1811_s23, 128 }
  0x56   : > { %s240_s20 = sshll.u32 %s233_s19, 4  ;;  %p1474_p11 = scmp.ne.s32.totalorder %s1811_s23, %s1473_s29  ;;  %s241_s20 = int_to_ptr.vmem [resolvable:$true] %s240_s20 }
  0x57   : > { %s1478_s26 = scalar_lea.hbm %s2027_s2, 256  ;;  %p1479_p5 = scmp.lt.u32.totalorder %s1811_s23, %s2027_s2 }
  0x58   : > { %p1476_p2 = pnand %p1474_p11, %p1766_p4  ;;  %p1480_p7 = scmp.lt.u32.totalorder %s1478_s26, %s1473_s29 }
  0x59   : > { %p1482_p12 = scmp.lt.u32.totalorder %s1473_s29, %s1811_s23 }
  0x5a   : > { %p1477_p3 = pneg %p1476_p2  ;;  %p1481_p10 = por %p1480_p7, %p1479_p5 }
  0x5c   : > { %p1483_p1 = por %p1482_p12, %p1481_p10 }
  0x5e   : > { %p1484_p8 = pnand %p1483_p1, %p1477_p3 }
  0x60   : > { %1487 = shalt.err (!%p1484_p8)
}
  0x61   : > { %s1488_s1 = scalar_lea.vmem %s241_s20, 128  ;;  %s1627_s9 = smov [#allocation7]  }
  0x62   : > { %p1489_p9 = scmp.ne.s32.totalorder %s241_s20, %s1488_s1  ;;  %s1493_s10 = sshll.u32 %s1627_s9, 4  ;;  %s1494_s10 = int_to_ptr.vmem [resolvable:$false] %s1493_s10 }
  0x63   : > { %s1495_s17 = scalar_lea.vmem %s1494_s10, 256  ;;  %p1496_p11 = scmp.lt.s32.totalorder %s241_s20, %s1494_s10 }
  0x64   : > { %p1491_p6 = pnand %p1489_p9, %p1766_p4  ;;  %p1497_p2 = scmp.lt.s32.totalorder %s1495_s17, %s1488_s1 }
  0x66   : > { %p1492_p13 = pneg %p1491_p6  ;;  %p1498_p0 = por %p1497_p2, %p1496_p11 }
  0x68   : > { %p1499_p5 = pnand %p1498_p0, %p1492_p13 }
  0x6a   : > { %1502 = shalt.err (!%p1499_p5)
}
  0x6b   : > { %p2055_p7 = scmp.ne.s32.totalorder %s2049_s8, 0  ;;  %s1858_s11 = scalar_lea.hbm %s2028_s3, %s1740_s7 }
  0x6c   : > { %s251_s13 = scalar_lea.vmem [#allocation8], %s1737_s6  ;;  %s248_s12 = scalar_lea.sflag [#allocation9], %s1734_s5 }
  0x6d   : > { %1329 = dma.hbm_to_vmem [thread:$0]  (!%p2055_p7), %s1811_s23, 128, %s241_s20, %s1760_s22  }
  0x6e   : > { %s259_s26 = sshll.u32 %s251_s13, 4  ;;  %s1503_s14 = scalar_lea.hbm %s1858_s11, 128  ;;  %s260_s26 = int_to_ptr.vmem [resolvable:$true] %s259_s26 }
  0x6f   : > { %p1504_p0 = scmp.ne.s32.totalorder %s1858_s11, %s1503_s14  ;;  %s1508_s23 = scalar_lea.hbm %s2028_s3, 256 }
  0x70   : > { %p1509_p12 = scmp.lt.u32.totalorder %s1858_s11, %s2028_s3  ;;  %p1510_p1 = scmp.lt.u32.totalorder %s1508_s23, %s1503_s14 }
  0x71   : > { %p1506_p3 = pnand %p1504_p0, %p1766_p4  ;;  %p1512_p9 = scmp.lt.u32.totalorder %s1503_s14, %s1858_s11 }
  0x72   : > { %p1511_p8 = por %p1510_p1, %p1509_p12 }
  0x73   : > { %p1507_p10 = pneg %p1506_p3 }
  0x74   : > { %p1513_p6 = por %p1512_p9, %p1511_p8 }
  0x76   : > { %p1514_p13 = pnand %p1513_p6, %p1507_p10 }
  0x78   : > { %1517 = shalt.err (!%p1514_p13)
}
  0x79   : > { %s1518_s5 = scalar_lea.vmem %s260_s26, 128  ;;  %s1628_s6 = smov [#allocation8]  }
  0x7a   : > { %p1519_p11 = scmp.ne.s32.totalorder %s260_s26, %s1518_s5  ;;  %s1523_s9 = sshll.u32 %s1628_s6, 4  ;;  %s1524_s9 = int_to_ptr.vmem [resolvable:$false] %s1523_s9 }
  0x7b   : > { %s1525_s10 = scalar_lea.vmem %s1524_s9, 256  ;;  %p1526_p0 = scmp.lt.s32.totalorder %s260_s26, %s1524_s9 }
  0x7c   : > { %p1521_p2 = pnand %p1519_p11, %p1766_p4  ;;  %p1527_p3 = scmp.lt.s32.totalorder %s1525_s10, %s1518_s5 }
  0x7e   : > { %p1522_p5 = pneg %p1521_p2  ;;  %p1528_p7 = por %p1527_p3, %p1526_p0 }
  0x80   : > { %p1529_p1 = pnand %p1528_p7, %p1522_p5 }
  0x82   : > { %1532 = shalt.err (!%p1529_p1)
}
  0x83   : > { %p2056_p12 = scmp.ne.s32.totalorder %s2049_s8, 0  ;;  %p2057_p10 = scmp.ne.s32.totalorder %s2054_s24, 0 }
  0x84   : > { %s1882_s25 = sand.u32 (!%p2057_p10), 1, %s1607_s16   ;;  %p2058_p4 = scmp.ne.s32.totalorder (!%p2057_p10), %s2045_s27, 0 }
  0x85   : > { %1332 = dma.hbm_to_vmem [thread:$0]  (!%p2056_p12), %s1858_s11, 128, %s260_s26, %s248_s12  }
  0x86   : > { %268 = sbr.rel (%p2057_p10) target bundleno = 1610 (0x64a), region = 36  ;;  %s1885_s17 = sshll.u32 (!%p2057_p10), %s1882_s25, 3 }
  0x87   : > { %s271_s19 = scalar_lea.sflag (!%p2057_p10), [#allocation3], %s1882_s25  ;;  %s274_s29 = scalar_lea.vmem (!%p2057_p10), [#allocation2], %s1885_s17 }
  0x8d   : > { %1586 = dma.done.wait (%p2058_p4), %s271_s19, 128  }
  0x8e   : > { %1588 = vsyncadd (%p2058_p4), %s271_s19, 4294967168  ;;  %s279_s8 = sand.u32 1, %s1696_s21   ;;  %s283_s11 = scalar_lea.vmem [#allocation5], %s1885_s17 }
  0x8f   : > { %s280_s24 = scalar_lea.sflag [#allocation6], %s279_s8 }
  0x90   : > { %1590 = dma.done.wait (%p2058_p4), %s280_s24, 256  }
  0x91   : > { %1592 = vsyncadd (%p2058_p4), %s280_s24, 4294967040  ;;  %s292_s13 = scalar_lea.vmem [#allocation7], %s1885_s17  ;;  %s298_s26 = scalar_lea.sflag [#allocation9], %s1882_s25 }
  0x92   : > { %s301_s12 = scalar_lea.vmem [#allocation8], %s1885_s17 }
  0x93   : > { %1594 = dma.done.wait (%p2058_p4), %s298_s26, 128  }
  0x94   : > { %1596 = vsyncadd (%p2058_p4), %s298_s26, 4294967168  ;;  %v1629_v0 = vmov 0.0   ;;  %vm1630_vm0 = vmmov 0   ;;  %vm343_vm1 = vcmask 64512   ;;  %v342_v1 = vld [vmem:[%s283_s11] sm:$0xff]  ;;  %v341_v2 = vld [vmem:[%s274_s29] sm:$0xff] }
  0x95   : > { %1270 = vmatprep.subr.mxu0 %v1629_v0  ;;  %1272 = vmatprep.mubr.msk.f32.mxu0 %vm1630_vm0, %v1629_v0  ;;  %s1631_s21 = smov 120   ;;  %s1632_s27 = smov 112   ;;  %v1922_v12 = vld [vmem:[%s292_s13] sm:$0xff]  ;;  %v433_v22 = vld [vmem:[%s301_s12] sm:$0xff]  ;;  %vm507_vm2 = vcmask 130048   ;;  %vm690_vm3 = vcmask 261248  }
  0x96   : > { %1275 = vmatprep.subr.mxu1 %v1629_v0  ;;  %1277 = vmatprep.mubr.msk.f32.mxu1 %vm1630_vm0, %v1629_v0  ;;  %s1633_s14 = smov 104   ;;  %s1945_s1 = scalar_lea.vmem [#allocation10], %s1885_s17  ;;  %vm873_vm4 = vcmask 392448   ;;  %vm1056_vm5 = vcmask 523648  }
  0x97   : > { %1271 = vmatpush3.xpose.msk.msra.mxu0 %vm343_vm1, %v342_v1  ;;  %515 = vrot.lane.b32.xlu1 %v342_v1, %s1631_s21  ;;  %s1634_s22 = smov 96   ;;  %s1635_s23 = smov 80  }
  0x98   : > { %1285 = vmatprep.subr.mxu0 %v1629_v0  ;;  %1276 = vmatpush3.msra.mxu1 %v1922_v12  ;;  %s1636_s20 = smov 16   ;;  %s1637_s7 = smov 32  }
  0x99   : > { %1280 = vmatprep.subr.mxu1 %v1629_v0  ;;  %s1638_s5 = smov 48   ;;  %s1251_s6 = sshll.u32 %s1615_s18, 7 }
  0x9a   : > { %1273 = vmatmul.mubr.msk.f32.vlgmr.msra.gmra.mrb[0].mxu0 %vm343_vm1, %v341_v2  ;;  %s1073_s9 = sshll.u32 %s1945_s1, 4  ;;  %s1975_s19 = scalar_lea.hbm %s2029_s4, %s1251_s6  ;;  %s1977_s9 = int_to_ptr.vmem [resolvable:$true] %s1073_s9 }
  0x9b   : > { %1287 = vmatprep.mubr.msk.f32.mxu0 %vm1630_vm0, %v1629_v0  ;;  %512 = vrot.lane.b32.xlu1 %v341_v2, %s1631_s21  ;;  %s1059_s29 = scalar_lea.sflag [#allocation4], %s1882_s25  ;;  %s1533_s8 = scalar_lea.vmem %s1977_s9, 128 }
  0x9c   : > { %p1534_p7 = scmp.ne.s32.totalorder %s1977_s9, %s1533_s8  ;;  %p2059_p8 = scmp.ne.s32.totalorder %s2046_s28, 0 }
  0x9d   : > { %s1639_s18 = smov [#allocation10]  }
  0x9e   : > { %p1535_p9 = pnand %p1534_p7, %p2059_p8  ;;  %s1537_s24 = sshll.u32 %s1639_s18, 4  ;;  %s1538_s24 = int_to_ptr.vmem [resolvable:$false] %s1537_s24 }
  0x9f   : > { %695 = vrot.lane.b32.xlu1 %v341_v2, %s1632_s27  ;;  %s1539_s11 = scalar_lea.vmem %s1538_s24, 256  ;;  %p1540_p13 = scmp.lt.s32.totalorder %s1977_s9, %s1538_s24 }
  0xa0   : > { %p1536_p6 = pneg %p1535_p9  ;;  %p1541_p11 = scmp.lt.s32.totalorder %s1539_s11, %s1533_s8 }
  0xa2   : > { %p1542_p2 = por %p1541_p11, %p1540_p13 }
  0xa3   : > { %881 = vrot.lane.b32.xlu1 %v342_v1, %s1633_s14 }
  0xa4   : > { %p1543_p5 = pnand %p1542_p2, %p1536_p6 }
  0xa7   : > { %878 = vrot.lane.b32.xlu1 %v341_v2, %s1633_s14 }
 0x109   : > { %v516_v13 = vpop.permute.xlu1 %515 }
 0x10d   : > { %v513_v15 = vpop.permute.xlu1 %512 }
 0x111   : > { %v696_v17 = vpop.permute.xlu1 %695 }
 0x115   : > { %v882_v20 = vpop.permute.xlu1 %881 }
 0x119   : > { %v879_v21 = vpop.permute.xlu1 %878 }
 0x16d   : > { %v416_v3 = vpop.f32.mrb[0].mxu0 }
 0x16e   : > { %v420_v4 = vmul.f32 0.35355338, %v416_v3  ;;  %v1274_v5 = vpop.f32.mrb[1].mxu0 }
 0x170   : > { %v421_v6 = vsel %vm343_vm1, %v420_v4, -inf }
 0x171   : > { %422 = vmax.xlane.f32.xlu0 %v421_v6 }
 0x1fe   : > { %v423_v7 = vpop.xlane.xlu0 %422 }
 0x1ff   : > { %v424_v8 = vsub.f32 %v420_v4, %v423_v7 }
 0x201   : > { %v425_v9 = vmul.f32 1.442695, %v424_v8 }
 0x203   : > { %1397 = vpow2.f32 %v425_v9 }
 0x20d   : > { %v1398_v10 = vpop.eup %1397 }
 0x20e   : > { %v427_v11 = vsel %vm343_vm1, %v1398_v10, 0.0 }
 0x20f   : > { %428 = vadd.xlane.f32.xlu0 %v427_v11 }
 0x225   : > { %698 = vrot.lane.b32.xlu0 %v342_v1, %s1632_s27 }
 0x29c   : > { %v429_v14 = vpop.xlane.xlu0 %428 }
 0x29d   : > { %1399 = vrcp.f32 %v429_v14 }
 0x2a0   : > { %v699_v19 = vpop.permute.xlu0 %698 }
 0x2a7   : > { %v1400_v16 = vpop.eup %1399 }
 0x2a8   : > { %v431_v18 = vmul.f32 %v1400_v16, %v1398_v10 }
 0x2aa   : > { %1278 = vmatmul.mubr.msk.f32.vlgmr.msra.gmra.mrb[0].mxu1 %vm343_vm1, %v431_v18 }
 0x2ab   : > { %1281 = vmatpush3.xpose.msk.msra.mxu1 %vm343_vm1, %v516_v13  ;;  %1282 = vmatprep.mubr.msk.f32.mxu1 %vm1630_vm0, %v1629_v0 }
 0x2ac   : > { %1290 = vmatprep.subr.mxu1 %v1629_v0 }
 0x2ae   : > { %1283 = vmatmul.mubr.msk.f32.vlgmr.msra.gmra.mrb[2].mxu1 %vm343_vm1, %v513_v15 }
 0x2af   : > { %1291 = vmatpush3.xpose.msk.msra.mxu1 %vm343_vm1, %v699_v19  ;;  %1292 = vmatprep.mubr.msk.f32.mxu1 %vm1630_vm0, %v1629_v0 }
 0x2b0   : > { %1300 = vmatprep.subr.mxu1 %v1629_v0 }
 0x2b2   : > { %1293 = vmatmul.mubr.msk.f32.vlgmr.msra.gmra.mrb[4].mxu1 %vm343_vm1, %v696_v17 }
 0x2b3   : > { %1301 = vmatpush3.xpose.msk.msra.mxu1 %vm343_vm1, %v882_v20  ;;  %1302 = vmatprep.mubr.msk.f32.mxu1 %vm1630_vm0, %v1629_v0 }
 0x2b6   : > { %1303 = vmatmul.mubr.msk.f32.vlgmr.msra.gmra.mrb[6].mxu1 %vm343_vm1, %v879_v21 }
 0x37d   : > { %v503_v23 = vpop.f32.mrb[0].mxu1 }
 0x37e   : > { %v504_v24 = vadd.f32 %v503_v23, %v433_v22  ;;  %v1279_v25 = vpop.f32.mrb[1].mxu1 }
 0x380   : > { %508 = vst.msk [vmem:[%s1945_s1] sm:$0xff] %vm507_vm2, %v504_v24 }
 0x381   : > { %v587_v26 = vpop.f32.mrb[2].mxu1 }
 0x382   : > { %v591_v27 = vmul.f32 0.35355338, %v587_v26  ;;  %v1284_v28 = vpop.f32.mrb[3].mxu1 }
 0x384   : > { %v592_v29 = vsel %vm343_vm1, %v591_v27, -inf }
 0x385   : > { %593 = vmax.xlane.f32.xlu1 %v592_v29  ;;  %v770_v30 = vpop.f32.mrb[4].mxu1 }
 0x386   : > { %v774_v31 = vmul.f32 0.35355338, %v770_v30  ;;  %v1294_v32 = vpop.f32.mrb[5].mxu1 }
 0x388   : > { %v775_v33 = vsel %vm343_vm1, %v774_v31, -inf }
 0x389   : > { %776 = vmax.xlane.f32.xlu0 %v775_v33  ;;  %v953_v34 = vpop.f32.mrb[6].mxu1 }
 0x38a   : > { %v957_v35 = vmul.f32 0.35355338, %v953_v34  ;;  %v1304_v36 = vpop.f32.mrb[7].mxu1 }
 0x38c   : > { %v958_v37 = vsel %vm343_vm1, %v957_v35, -inf }
 0x38d   : > { %959 = vmax.xlane.f32.xlu1 %v958_v37 }
 0x412   : > { %v594_v38 = vpop.xlane.xlu1 %593 }
 0x413   : > { %v595_v39 = vsub.f32 %v591_v27, %v594_v38 }
 0x415   : > { %v596_v40 = vmul.f32 1.442695, %v595_v39 }
 0x416   : > { %v777_v41 = vpop.xlane.xlu0 %776 }
 0x417   : > { %1401 = vpow2.f32 %v596_v40  ;;  %v778_v42 = vsub.f32 %v774_v31, %v777_v41 }
 0x419   : > { %v779_v43 = vmul.f32 1.442695, %v778_v42 }
 0x41a   : > { %v960_v48 = vpop.xlane.xlu1 %959 }
 0x41b   : > { %1403 = vpow2.f32 %v779_v43  ;;  %v961_v49 = vsub.f32 %v957_v35, %v960_v48 }
 0x41d   : > { %v962_v50 = vmul.f32 1.442695, %v961_v49 }
 0x41f   : > { %1405 = vpow2.f32 %v962_v50 }
 0x421   : > { %v1402_v44 = vpop.eup %1401 }
 0x422   : > { %v598_v45 = vsel %vm343_vm1, %v1402_v44, 0.0 }
 0x423   : > { %599 = vadd.xlane.f32.xlu1 %v598_v45 }
 0x425   : > { %v1404_v46 = vpop.eup %1403 }
 0x426   : > { %v781_v47 = vsel %vm343_vm1, %v1404_v46, 0.0 }
 0x427   : > { %782 = vadd.xlane.f32.xlu0 %v781_v47 }
 0x429   : > { %v1406_v51 = vpop.eup %1405 }
 0x42a   : > { %v964_v52 = vsel %vm343_vm1, %v1406_v51, 0.0 }
 0x434   : > { %789 = vrot.lane.b32.xlu1 %v1922_v12, %s1634_s22 }
 0x43d   : > { %606 = vrot.lane.b32.xlu0 %v1922_v12, %s1632_s27 }
 0x441   : > { %610 = vrot.lane.b32.xlu0 %v433_v22, %s1632_s27 }
 0x445   : > { %976 = vrot.lane.b32.xlu0 %v433_v22, %s1635_s23 }
 0x458   : > { %965 = vadd.xlane.f32.xlu1 %v964_v52 }
 0x469   : > { %972 = vrot.lane.b32.xlu1 %v1922_v12, %s1635_s23 }
 0x46d   : > { %793 = vrot.lane.b32.xlu1 %v433_v22, %s1634_s22 }
 0x4b0   : > { %v600_v53 = vpop.xlane.xlu1 %599 }
 0x4b1   : > { %1407 = vrcp.f32 %v600_v53 }
 0x4b4   : > { %v783_v54 = vpop.xlane.xlu0 %782  ;;  %v790_v58 = vpop.permute.xlu1 %789 }
 0x4b5   : > { %1409 = vrcp.f32 %v783_v54 }
 0x4b8   : > { %v607_v55 = vpop.permute.xlu0 %606 }
 0x4b9   : > { %1286 = vmatpush3.msra.mxu0 %v607_v55 }
 0x4ba   : > { %1295 = vmatprep.subr.mxu0 %v1629_v0 }
 0x4bb   : > { %v1408_v56 = vpop.eup %1407 }
 0x4bc   : > { %v602_v57 = vmul.f32 %v1408_v56, %v1402_v44  ;;  %v611_v2 = vpop.permute.xlu0 %610 }
 0x4be   : > { %1288 = vmatmul.mubr.msk.f32.vlgmr.msra.gmra.mrb[2].mxu0 %vm343_vm1, %v602_v57 }
 0x4bf   : > { %v1410_v59 = vpop.eup %1409  ;;  %1296 = vmatpush3.msra.mxu0 %v790_v58  ;;  %1297 = vmatprep.mubr.msk.f32.mxu0 %vm1630_vm0, %v1629_v0 }
 0x4c0   : > { %v785_v60 = vmul.f32 %v1410_v59, %v1404_v46  ;;  %1305 = vmatprep.subr.mxu0 %v1629_v0  ;;  %v977_v9 = vpop.permute.xlu0 %976 }
 0x4c2   : > { %1298 = vmatmul.mubr.msk.f32.vlgmr.msra.gmra.mrb[4].mxu0 %vm343_vm1, %v785_v60 }
 0x4c3   : > { %1307 = vmatprep.mubr.msk.f32.mxu0 %vm1630_vm0, %v1629_v0 }
 0x4e5   : > { %v966_v61 = vpop.xlane.xlu1 %965 }
 0x4e6   : > { %1411 = vrcp.f32 %v966_v61 }
 0x4e9   : > { %v973_v62 = vpop.permute.xlu1 %972 }
 0x4ea   : > { %1306 = vmatpush3.msra.mxu0 %v973_v62 }
 0x4ed   : > { %v794_v6 = vpop.permute.xlu1 %793 }
 0x4f0   : > { %v1412_v63 = vpop.eup %1411 }
 0x4f1   : > { %v968_v1 = vmul.f32 %v1412_v63, %v1406_v51 }
 0x4f3   : > { %1308 = vmatmul.mubr.msk.f32.vlgmr.msra.gmra.mrb[6].mxu0 %vm343_vm1, %v968_v1 }
 0x591   : > { %v682_v3 = vpop.f32.mrb[2].mxu0 }
 0x592   : > { %v683_v4 = vadd.f32 %v682_v3, %v611_v2  ;;  %v1289_v5 = vpop.f32.mrb[3].mxu0 }
 0x594   : > { %687 = vrot.lane.b32.xlu1 %v683_v4, %s1636_s20 }
 0x595   : > { %v865_v7 = vpop.f32.mrb[4].mxu0 }
 0x596   : > { %v866_v8 = vadd.f32 %v865_v7, %v794_v6  ;;  %v1299_v0 = vpop.f32.mrb[5].mxu0 }
 0x598   : > { %870 = vrot.lane.b32.xlu0 %v866_v8, %s1637_s7 }
 0x5c6   : > { %v1048_v10 = vpop.f32.mrb[6].mxu0 }
 0x5c7   : > { %v1049_v11 = vadd.f32 %v1048_v10, %v977_v9  ;;  %v1309_v12 = vpop.f32.mrb[7].mxu0 }
 0x5c9   : > { %1053 = vrot.lane.b32.xlu1 %v1049_v11, %s1638_s5 }
 0x606   : > { %v688_v13 = vpop.permute.xlu1 %687 }
 0x607   : > { %691 = vst.msk [vmem:[%s1945_s1] sm:$0xff] %vm690_vm3, %v688_v13 }
 0x60a   : > { %v871_v14 = vpop.permute.xlu0 %870 }
 0x60b   : > { %874 = vst.msk [vmem:[%s1945_s1] sm:$0xff] %vm873_vm4, %v871_v14 }
 0x63b   : > { %v1054_v15 = vpop.permute.xlu1 %1053 }
 0x63c   : > { %1057 = vst.msk [vmem:[%s1945_s1] sm:$0xff] %vm1056_vm5, %v1054_v15 }
 0x63d   : > { %1546 = shalt.err (!%p1543_p5)
}
 0x63e   : > { %s1547_s25 = scalar_lea.hbm %s1975_s19, 128  ;;  %s1551_s12 = scalar_lea.hbm %s2029_s4, 256 }
 0x63f   : > { %p1548_p0 = scmp.ne.s32.totalorder %s1975_s19, %s1547_s25  ;;  %p1552_p12 = scmp.lt.u32.totalorder %s1975_s19, %s2029_s4 }
 0x640   : > { %p1553_p10 = scmp.lt.u32.totalorder %s1551_s12, %s1547_s25  ;;  %p1555_p7 = scmp.lt.u32.totalorder %s1547_s25, %s1975_s19 }
 0x641   : > { %p1549_p3 = pnand %p1548_p0, %p2059_p8 }
 0x642   : > { %p1554_p4 = por %p1553_p10, %p1552_p12 }
 0x643   : > { %p1550_p1 = pneg %p1549_p3 }
 0x644   : > { %p1556_p9 = por %p1555_p7, %p1554_p4 }
 0x646   : > { %p1557_p6 = pnand %p1556_p9, %p1550_p1 }
 0x648   : > { %1560 = shalt.err (!%p1557_p6)
}
 0x649   : > { %1318 = dma.vmem_to_hbm [thread:$0]  (%p2059_p8), %s1977_s9, 128, %s1975_s19, %s1059_s29  }
 0x64a PF: > { %s2060_s14 = sld [smem:[#allocation17_spill]]  ;;  %s1085_s1 = sand.u32 1, %s1603_s15  }
 0x64b   : > { %p2061_p13 = scmp.ne.s32.totalorder %s2048_s30, 0  ;;  %s1086_s22 = scalar_lea.sflag [#allocation4], %s1085_s1 }
 0x650   : > { %p2062_p11 = scmp.ge.s32.totalorder %s2060_s14, 2 }
 0x652   : > { %p1334_p2 = pnand %p2062_p11, %p2061_p13 }
 0x654   : > { %1598 = dma.done.wait (!%p1334_p2), %s1086_s22, 128  }
 0x655   : > { %1600 = vsyncadd (!%p1334_p2), %s1086_s22, 4294967168  ;;  %s26_s20 = sadd.s32 1, %s2060_s14   ;;  %s2063_s23 = sld [smem:[#allocation15_spill]] }
 0x656   : > { %p23_p5 = scmp.ge.s32.totalorder %s26_s20, 4   ;;  %s2064_s17 = sld [smem:[#allocation19_spill]] }
 0x657   : > { %s2065_s18 = sld [smem:[#allocation16_spill]]  ;;  %s2066_s19 = sld [smem:[#allocation18_spill]] }
 0x658   : > { %s2067_s15 = smov %s1607_s16  ;;  %25 = sbr.rel (!%p23_p5) target bundleno = 12 (0xc), region = 118 }
 0x65b   : > { %s2068_s16 = smov %s2063_s23 }
 0x65f   :  { %1091 = vsyncpa [#allocation3], 1 }
 0x660   :  { %1093 = vsyncpa [#allocation3 + $0x1], 1 }
 0x661   :  { %1094 = vsyncpa [#allocation6], 1 }
 0x662   :  { %1096 = vsyncpa [#allocation6 + $0x1], 1 }
 0x663   :  { %1097 = vsyncpa [#allocation9], 1 }
 0x664   :  { %1099 = vsyncpa [#allocation9 + $0x1], 1 }
 0x665   :  { %1100 = vsyncpa [#allocation4], 1 }
 0x666   :  { %1102 = vsyncpa [#allocation4 + $0x1], 1 }

</bundles_post_ra>
